<compile_context>
chip_gen: v7x
topology: tpu7x:2x2x1
jax: 0.10.0
libtpu: 0.0.40
codegen_flags: <defaults>
</compile_context>

<pallas_src>
import jax
import jax.numpy as jnp
from jax.experimental import pallas as pl
from jax.experimental.pallas import tpu as pltpu

# Small, self-chosen resolution (client.xRes / client.yRes are external in the
# original script).
xRes = 16
yRes = 16
IN_DIM = xRes * yRes      # 256
HID = 60                  # logical hidden size (matches the PyTorch module)
HID_PAD = 128             # padded hidden size used inside the kernel
OUT_DIM = xRes * yRes     # 256


def _round_up(n, m):
    return ((n + m - 1) // m) * m


def mlp_kernel(x_ref, w1_ref, b1_ref, w2_ref, b2_ref, w3_ref, b3_ref, o_ref):
    x = x_ref[...]
    # Layer 1: Linear + ReLU (accumulate in f32, ReLU in f32 for v5e's VPU).
    h1 = jnp.dot(x, w1_ref[...], preferred_element_type=jnp.float32) + b1_ref[...]
    h1 = jnp.maximum(h1, 0.0)
    # Layer 2: Linear + ReLU.
    h2 = jnp.dot(h1.astype(w2_ref.dtype), w2_ref[...],
                 preferred_element_type=jnp.float32) + b2_ref[...]
    h2 = jnp.maximum(h2, 0.0)
    # Layer 3: Linear (logits).
    # NOTE: biases are read exactly once per tile; if an inner loop is ever
    # added, keep the b*_ref reads hoisted (JAX does not CSE broadcast_in_dim).
    o_ref[...] = (
        jnp.dot(h2.astype(w3_ref.dtype), w3_ref[...],
                preferred_element_type=jnp.float32) + b3_ref[...]
    ).astype(o_ref.dtype)


def _pad_params(params, compute_dtype):
    """Zero-pad hidden dim 60 -> 128; cast weights to compute_dtype, biases f32."""
    def pad2(a, rows, cols):
        return jnp.pad(a, ((0, rows - a.shape[0]), (0, cols - a.shape[1])))

    w1 = pad2(params["w1"], IN_DIM, HID_PAD).astype(compute_dtype)
    b1 = pad2(params["b1"], 1, HID_PAD).astype(jnp.float32)
    w2 = pad2(params["w2"], HID_PAD, HID_PAD).astype(compute_dtype)
    b2 = pad2(params["b2"], 1, HID_PAD).astype(jnp.float32)
    w3 = pad2(params["w3"], HID_PAD, OUT_DIM).astype(compute_dtype)
    b3 = params["b3"].astype(jnp.float32)
    return w1, b1, w2, b2, w3, b3


def neural_network_forward(x, params, *, tb_max=512, use_bf16=False):
    """x: (B, xRes, yRes) or (B, IN_DIM).  Returns (B, OUT_DIM) float32."""
    B = x.shape[0]
    x2d = x.reshape(B, -1).astype(jnp.float32)   # nn.Flatten
    assert x2d.shape[1] == IN_DIM

    compute_dtype = jnp.bfloat16 if use_bf16 else jnp.float32
    w1, b1, w2, b2, w3, b3 = _pad_params(params, compute_dtype)

    # Batch tiling: TB rows per grid step, multiple of 8 (sublane-aligned),
    # capped at tb_max so 2 buffers * (x + out) tiles stay << VMEM (v7x 64 MiB).
    bp8 = _round_up(B, 8)
    TB = min(tb_max, bp8)
    Bp = _round_up(B, TB)
    if Bp != B:
        x2d = jnp.pad(x2d, ((0, Bp - B), (0, 0)))
    x2d = x2d.astype(compute_dtype)

    grid = (Bp // TB,)

    resident = lambda a: pl.BlockSpec(a.shape, lambda i: (0, 0))

    out = pl.pallas_call(
        mlp_kernel,
        out_shape=jax.ShapeDtypeStruct((Bp, OUT_DIM), jnp.float32),
        grid=grid,
        in_specs=[
            pl.BlockSpec((TB, IN_DIM), lambda i: (i, 0)),   # x: tiled over batch
            resident(w1), resident(b1),                     # weights/biases stay
            resident(w2), resident(b2),                     # VMEM-resident across
            resident(w3), resident(b3),                     # grid iterations
        ],
        out_specs=pl.BlockSpec((TB, OUT_DIM), lambda i: (i, 0)),
        compiler_params=pltpu.CompilerParams(
            dimension_semantics=("parallel",)),             # 2 TCs on v7x
    )(x2d, w1, b1, w2, b2, w3, b3)

    return out[:B]


def init_params(key):
    """Deterministic init mimicking torch.nn.Linear default (U[-1/sqrt(fan_in), ...]).

    Weights are stored as (in_features, out_features) at the LOGICAL sizes
    (hidden=60); padding to 128 happens inside the wrapper."""
    ks = jax.random.split(key, 6)

    def linear(kw, kb, fan_in, fan_out):
        bound = 1.0 / jnp.sqrt(fan_in)
        w = jax.random.uniform(kw, (fan_in, fan_out), jnp.float32, -bound, bound)
        b = jax.random.uniform(kb, (1, fan_out), jnp.float32, -bound, bound)
        return w, b

    w1, b1 = linear(ks[0], ks[1], IN_DIM, HID)
    w2, b2 = linear(ks[2], ks[3], HID, HID)
    w3, b3 = linear(ks[4], ks[5], HID, OUT_DIM)
    return {"w1": w1, "b1": b1, "w2": w2, "b2": b2, "w3": w3, "b3": b3}


def reference_forward(x2d, p, compute_dtype=jnp.float32):
    """Pure-JAX reference (optionally mirroring the bf16 cast of the kernel)."""
    xd = x2d.astype(compute_dtype)
    w1 = p["w1"].astype(compute_dtype)
    w2 = p["w2"].astype(compute_dtype)
    w3 = p["w3"].astype(compute_dtype)
    h1 = jnp.maximum(
        jnp.dot(xd, w1, preferred_element_type=jnp.float32) + p["b1"], 0.0)
    h2 = jnp.maximum(
        jnp.dot(h1.astype(compute_dtype), w2,
                preferred_element_type=jnp.float32) + p["b2"], 0.0)
    return jnp.dot(h2.astype(compute_dtype), w3,
                   preferred_element_type=jnp.float32) + p["b3"]


if __name__ == "__main__":
    key = jax.random.PRNGKey(0)
    k_x, k_p = jax.random.split(key)

    B = 2
    x = jax.random.normal(k_x, (B, xRes, yRes), jnp.float32)
    params = init_params(k_p)
    x2d = x.reshape(B, -1)

    # f32 path: must match the pure-JAX reference tightly.
    out = jax.block_until_ready(neural_network_forward(x, params))
    ref = reference_forward(x2d, params)
    assert out.shape == (B, OUT_DIM)
    assert jnp.allclose(out, ref, atol=1e-4, rtol=1e-4), "f32 mismatch vs reference"

    # bf16 path (v6e/v7x MXU-native, halves HBM traffic): compare against a
    # reference that uses the same bf16-cast inputs with f32 accumulation.
    out_bf = jax.block_until_ready(neural_network_forward(x, params, use_bf16=True))
    ref_bf = reference_forward(x2d, params, compute_dtype=jnp.bfloat16)
    assert out_bf.shape == (B, OUT_DIM)
    assert bool(jnp.all(jnp.isfinite(out_bf)))
    assert jnp.allclose(out_bf, ref_bf, atol=5e-2, rtol=5e-2), "bf16 mismatch"

    print("KERNEL_OK")
</pallas_src>

<mosaic_0001>
module attributes {stable_mosaic.version = 11 : i64} {
  func.func @mlp_kernel(%arg0: i32, %arg1: memref<8x256xf32, #tpu.memory_space<vmem>>, %arg2: memref<256x128xf32, #tpu.memory_space<vmem>>, %arg3: memref<1x128xf32, #tpu.memory_space<vmem>>, %arg4: memref<128x128xf32, #tpu.memory_space<vmem>>, %arg5: memref<1x128xf32, #tpu.memory_space<vmem>>, %arg6: memref<128x256xf32, #tpu.memory_space<vmem>>, %arg7: memref<1x256xf32, #tpu.memory_space<vmem>>, %arg8: memref<8x256xf32, #tpu.memory_space<vmem>>) attributes {dimension_semantics = [#tpu.dimension_semantics<parallel>], iteration_bounds = array<i64: 1>, scalar_prefetch = 0 : i64, scratch_operands = 0 : i64, tpu.core_type = #tpu.core_type<tc>, window_params = [{transform_indices = @transform_0, window_bounds = array<i64: 8, 256>}, {pipeline_mode = #tpu.pipeline_mode<synchronous>, transform_indices = @transform_1, window_bounds = array<i64: 256, 128>}, {pipeline_mode = #tpu.pipeline_mode<synchronous>, transform_indices = @transform_2, window_bounds = array<i64: 1, 128>}, {pipeline_mode = #tpu.pipeline_mode<synchronous>, transform_indices = @transform_3, window_bounds = array<i64: 128, 128>}, {pipeline_mode = #tpu.pipeline_mode<synchronous>, transform_indices = @transform_4, window_bounds = array<i64: 1, 128>}, {pipeline_mode = #tpu.pipeline_mode<synchronous>, transform_indices = @transform_5, window_bounds = array<i64: 128, 256>}, {pipeline_mode = #tpu.pipeline_mode<synchronous>, transform_indices = @transform_6, window_bounds = array<i64: 1, 256>}, {transform_indices = @transform_7, window_bounds = array<i64: 8, 256>}]} {
    %c0 = arith.constant 0 : index
    %c0_0 = arith.constant 0 : index
    %0 = vector.load %arg1[%c0, %c0_0] : memref<8x256xf32, #tpu.memory_space<vmem>>, vector<8x256xf32>
    %c0_1 = arith.constant 0 : index
    %c0_2 = arith.constant 0 : index
    %1 = vector.load %arg2[%c0_1, %c0_2] : memref<256x128xf32, #tpu.memory_space<vmem>>, vector<256x128xf32>
    %cst = arith.constant dense<0.000000e+00> : vector<8x128xf32>
    %2 = tpu.matmul %0, %1, %cst {dimension_numbers = #tpu.dot_dimension_numbers<[1], [0], [0], [1], [0, 0, 1, 1], [], []>} : vector<8x256xf32>, vector<256x128xf32>, vector<8x128xf32> -> vector<8x128xf32>
    %c0_3 = arith.constant 0 : index
    %c0_4 = arith.constant 0 : index
    %3 = vector.load %arg3[%c0_3, %c0_4] : memref<1x128xf32, #tpu.memory_space<vmem>>, vector<1x128xf32>
    %4 = vector.broadcast %3 : vector<1x128xf32> to vector<8x128xf32>
    %5 = arith.addf %2, %4 : vector<8x128xf32>
    %cst_5 = arith.constant 0.000000e+00 : f32
    %6 = vector.broadcast %cst_5 : f32 to vector<8x128xf32>
    %7 = arith.maximumf %5, %6 : vector<8x128xf32>
    %c0_6 = arith.constant 0 : index
    %c0_7 = arith.constant 0 : index
    %8 = vector.load %arg4[%c0_6, %c0_7] : memref<128x128xf32, #tpu.memory_space<vmem>>, vector<128x128xf32>
    %cst_8 = arith.constant dense<0.000000e+00> : vector<8x128xf32>
    %9 = tpu.matmul %7, %8, %cst_8 {dimension_numbers = #tpu.dot_dimension_numbers<[1], [0], [0], [1], [0, 0, 1, 1], [], []>} : vector<8x128xf32>, vector<128x128xf32>, vector<8x128xf32> -> vector<8x128xf32>
    %c0_9 = arith.constant 0 : index
    %c0_10 = arith.constant 0 : index
    %10 = vector.load %arg5[%c0_9, %c0_10] : memref<1x128xf32, #tpu.memory_space<vmem>>, vector<1x128xf32>
    %11 = vector.broadcast %10 : vector<1x128xf32> to vector<8x128xf32>
    %12 = arith.addf %9, %11 : vector<8x128xf32>
    %cst_11 = arith.constant 0.000000e+00 : f32
    %13 = vector.broadcast %cst_11 : f32 to vector<8x128xf32>
    %14 = arith.maximumf %12, %13 : vector<8x128xf32>
    %c0_12 = arith.constant 0 : index
    %c0_13 = arith.constant 0 : index
    %15 = vector.load %arg6[%c0_12, %c0_13] : memref<128x256xf32, #tpu.memory_space<vmem>>, vector<128x256xf32>
    %cst_14 = arith.constant dense<0.000000e+00> : vector<8x256xf32>
    %16 = tpu.matmul %14, %15, %cst_14 {dimension_numbers = #tpu.dot_dimension_numbers<[1], [0], [0], [1], [0, 0, 1, 1], [], []>} : vector<8x128xf32>, vector<128x256xf32>, vector<8x256xf32> -> vector<8x256xf32>
    %c0_15 = arith.constant 0 : index
    %c0_16 = arith.constant 0 : index
    %17 = vector.load %arg7[%c0_15, %c0_16] : memref<1x256xf32, #tpu.memory_space<vmem>>, vector<1x256xf32>
    %18 = vector.broadcast %17 : vector<1x256xf32> to vector<8x256xf32>
    %19 = arith.addf %16, %18 : vector<8x256xf32>
    %c0_17 = arith.constant 0 : index
    %c0_18 = arith.constant 0 : index
    %20 = vector.load %arg8[%c0_17, %c0_18] : memref<8x256xf32, #tpu.memory_space<vmem>>, vector<8x256xf32>
    tpu.vector_store %arg8[%c0_17, %c0_18], %19 {strides = array<i32>} : memref<8x256xf32, #tpu.memory_space<vmem>>, vector<8x256xf32>,
    return
  }
  func.func @transform_0(%arg0: i32) -> (i32, i32) {
    %c0_i32 = arith.constant 0 : i32
    %c0_i32_0 = arith.constant 0 : i32
    return %arg0, %c0_i32 : i32, i32
  }
  func.func @transform_1(%arg0: i32) -> (i32, i32) {
    %c0_i32 = arith.constant 0 : i32
    %c0_i32_0 = arith.constant 0 : i32
    %c0_i32_1 = arith.constant 0 : i32
    return %c0_i32, %c0_i32_0 : i32, i32
  }
  func.func @transform_2(%arg0: i32) -> (i32, i32) {
    %c0_i32 = arith.constant 0 : i32
    %c0_i32_0 = arith.constant 0 : i32
    %c0_i32_1 = arith.constant 0 : i32
    return %c0_i32, %c0_i32_0 : i32, i32
  }
  func.func @transform_3(%arg0: i32) -> (i32, i32) {
    %c0_i32 = arith.constant 0 : i32
    %c0_i32_0 = arith.constant 0 : i32
    %c0_i32_1 = arith.constant 0 : i32
    return %c0_i32, %c0_i32_0 : i32, i32
  }
  func.func @transform_4(%arg0: i32) -> (i32, i32) {
    %c0_i32 = arith.constant 0 : i32
    %c0_i32_0 = arith.constant 0 : i32
    %c0_i32_1 = arith.constant 0 : i32
    return %c0_i32, %c0_i32_0 : i32, i32
  }
  func.func @transform_5(%arg0: i32) -> (i32, i32) {
    %c0_i32 = arith.constant 0 : i32
    %c0_i32_0 = arith.constant 0 : i32
    %c0_i32_1 = arith.constant 0 : i32
    return %c0_i32, %c0_i32_0 : i32, i32
  }
  func.func @transform_6(%arg0: i32) -> (i32, i32) {
    %c0_i32 = arith.constant 0 : i32
    %c0_i32_0 = arith.constant 0 : i32
    %c0_i32_1 = arith.constant 0 : i32
    return %c0_i32, %c0_i32_0 : i32, i32
  }
  func.func @transform_7(%arg0: i32) -> (i32, i32) {
    %c0_i32 = arith.constant 0 : i32
    %c0_i32_0 = arith.constant 0 : i32
    return %arg0, %c0_i32 : i32, i32
  }
}

</mosaic_0001>

<bundles_post_ra>
// kernel: tpu_custom_call.1
= control target key start
LH: loop header
LB: loop body
LE: loop exit
PB: predicated region body
PF: predicated region fallthrough
CT: control target
= control target key end

     0   :  { %12 = vsyncpa [#allocation3], 0  ;;  %s862_s0 = inlined_call_operand.hbm [shape: f32[8,256], index: 0, kind: input, shape index: {}]   ;;  %s863_s1 = inlined_call_operand.hbm [shape: f32[256,128], index: 1, kind: input, shape index: {}]   ;;  %s864_s2 = inlined_call_operand.vmem [shape: f32[1,128], index: 2, kind: input, shape index: {}]   ;;  %s865_s3 = inlined_call_operand.hbm [shape: f32[128,128], index: 3, kind: input, shape index: {}]   ;;  %s866_s4 = inlined_call_operand.vmem [shape: f32[1,128], index: 4, kind: input, shape index: {}]   ;;  %s867_s5 = inlined_call_operand.hbm [shape: f32[128,256], index: 5, kind: input, shape index: {}]   ;;  %s868_s6 = inlined_call_operand.vmem [shape: f32[1,256], index: 6, kind: input, shape index: {}]   ;;  %s869_s7 = inlined_call_operand.hbm [shape: f32[8,256], index: 7, kind: output, shape index: {}]  }
   0x1   :  { %13 = vsyncpa [#allocation6], 0 }
   0x2   :  { %14 = vsyncpa [#allocation9], 0 }
   0x3   :  { %15 = vsyncpa [#allocation4], 0  ;;  %s727_s24 = smov [#allocation5]   ;;  %s609_s28 = scalar_lea.hbm %s863_s1, 4096 }
   0x4   :  { %s31_s25 = sshll.u32 %s727_s24, 4  ;;  %p610_p0 = scmp.ne.s32.totalorder %s863_s1, %s609_s28  ;;  %s32_s25 = int_to_ptr.vmem [resolvable:$true] %s31_s25 }
   0x5   :  { %p613_p1 = scmp.lt.u32.totalorder %s609_s28, %s863_s1 }
   0x7   :  { %p615_p2 = pnand %p613_p1, %p610_p0 }
   0x9   :  { %618 = shalt.err (!%p615_p2)
}
   0xa   :  { %s619_s10 = scalar_lea.vmem %s32_s25, 4096  ;;  %p624_p4 = scmp.lt.s32.totalorder %s32_s25, %s32_s25 }
   0xb   :  { %p620_p3 = scmp.ne.s32.totalorder %s32_s25, %s619_s10  ;;  %p625_p5 = scmp.lt.s32.totalorder %s619_s10, %s619_s10 }
   0xd   :  { %p626_p6 = por %p625_p5, %p624_p4 }
   0xf   :  { %p627_p7 = pnand %p626_p6, %p620_p3 }
  0x11   :  { %630 = shalt.err (!%p627_p7)
}
  0x12   :  { %s728_s11 = smov 128   ;;  %s729_s12 = smov 8  }
  0x13   :  { %37 = dma.hbm_to_vmem [thread:$0]  %s863_s1, 4096, %s32_s25, [#allocation6], %s728_s11, %s728_s11, %s729_s12  }
  0x14   :  { %s730_s15 = smov [#allocation2]   ;;  %s731_s17 = smov [#allocation7]  }
  0x15   :  { %s22_s16 = sshll.u32 %s730_s15, 4  ;;  %s45_s18 = sshll.u32 %s731_s17, 4  ;;  %s23_s16 = int_to_ptr.vmem [resolvable:$true] %s22_s16  ;;  %s46_s18 = int_to_ptr.vmem [resolvable:$true] %s45_s18 }
  0x16   :  { %s631_s21 = scalar_lea.hbm %s862_s0, 256 }
  0x17   :  { %p632_p8 = scmp.ne.s32.totalorder %s862_s0, %s631_s21  ;;  %p635_p9 = scmp.lt.u32.totalorder %s631_s21, %s862_s0 }
  0x19   :  { %p637_p10 = pnand %p635_p9, %p632_p8 }
  0x1b   :  { %640 = shalt.err (!%p637_p10)
}
  0x1c   :  { %s641_s1 = scalar_lea.vmem %s23_s16, 256  ;;  %p646_p12 = scmp.lt.s32.totalorder %s23_s16, %s23_s16 }
  0x1d   :  { %p642_p11 = scmp.ne.s32.totalorder %s23_s16, %s641_s1  ;;  %p647_p13 = scmp.lt.s32.totalorder %s641_s1, %s641_s1 }
  0x1f   :  { %p648_p0 = por %p647_p13, %p646_p12 }
  0x21   :  { %p649_p1 = pnand %p648_p0, %p642_p11 }
  0x23   :  { %652 = shalt.err (!%p649_p1)
}
  0x24   :  { %25 = dma.hbm_to_vmem [thread:$0]  %s862_s0, 256, %s23_s16, [#allocation3]  }
  0x25   :  { %s653_s30 = scalar_lea.hbm %s865_s3, 2048 }
  0x26   :  { %p654_p2 = scmp.ne.s32.totalorder %s865_s3, %s653_s30  ;;  %p657_p3 = scmp.lt.u32.totalorder %s653_s30, %s865_s3 }
  0x28   :  { %p659_p4 = pnand %p657_p3, %p654_p2 }
  0x2a   :  { %662 = shalt.err (!%p659_p4)
}
  0x2b   :  { %s663_s14 = scalar_lea.vmem %s46_s18, 2048  ;;  %p668_p6 = scmp.lt.s32.totalorder %s46_s18, %s46_s18 }
  0x2c   :  { %p664_p5 = scmp.ne.s32.totalorder %s46_s18, %s663_s14  ;;  %p669_p7 = scmp.lt.s32.totalorder %s663_s14, %s663_s14 }
  0x2e   :  { %p670_p8 = por %p669_p7, %p668_p6 }
  0x30   :  { %p671_p9 = pnand %p670_p8, %p664_p5 }
  0x32   :  { %674 = shalt.err (!%p671_p9)
}
  0x33   :  { %51 = dma.hbm_to_vmem [thread:$0]  %s865_s3, 2048, %s46_s18, [#allocation6], %s728_s11, %s728_s11, %s729_s12  }
  0x34   :  { %s732_s16 = smov [#allocation8]   ;;  %s675_s21 = scalar_lea.hbm %s867_s5, 4096 }
  0x35   :  { %s59_s17 = sshll.u32 %s732_s16, 4  ;;  %p676_p10 = scmp.ne.s32.totalorder %s867_s5, %s675_s21  ;;  %s60_s17 = int_to_ptr.vmem [resolvable:$true] %s59_s17 }
  0x36   :  { %p679_p11 = scmp.lt.u32.totalorder %s675_s21, %s867_s5 }
  0x38   :  { %p681_p12 = pnand %p679_p11, %p676_p10 }
  0x3a   :  { %684 = shalt.err (!%p681_p12)
}
  0x3b   :  { %s685_s1 = scalar_lea.vmem %s60_s17, 4096  ;;  %p690_p0 = scmp.lt.s32.totalorder %s60_s17, %s60_s17 }
  0x3c   :  { %p686_p13 = scmp.ne.s32.totalorder %s60_s17, %s685_s1  ;;  %p691_p1 = scmp.lt.s32.totalorder %s685_s1, %s685_s1 }
  0x3e   :  { %p692_p2 = por %p691_p1, %p690_p0 }
  0x40   :  { %p693_p3 = pnand %p692_p2, %p686_p13 }
  0x42   :  { %696 = shalt.err (!%p693_p3)
}
  0x43   :  { %s733_s3 = smov 256   ;;  %s734_s11 = smov 16  }
  0x44   :  { %65 = dma.hbm_to_vmem [thread:$0]  %s867_s5, 4096, %s60_s17, [#allocation9], %s733_s3, %s733_s3, %s734_s11  }
  0x45   :  { %719 = dma.done.wait [#allocation3], 256  }
  0x46   :  { %720 = vsyncadd [#allocation3], 4294967040 }
  0x47   :  { %721 = dma.done.wait [#allocation6], 6144  }
  0x48   :  { %722 = vsyncadd [#allocation6], 4294961152 }
  0x49   :  { %723 = dma.done.wait [#allocation9], 4096  }
  0x4a   :  { %724 = vsyncadd [#allocation9], 4294963200  ;;  %v735_v0 = vmov 0.0|0.0   ;;  %v98_v1 = vld [vmem:[#allocation5 + $0x80] sm:$0xff]  ;;  %v99_v2 = vld [vmem:[#allocation5 + $0x88] sm:$0xff]  ;;  %vm736_vm0 = vmmov 0  }
  0x4b   :  { %541 = vmatprep.subr.bf16.mxu1 %v735_v0  ;;  %v82_v3 = vld [vmem:[#allocation5] sm:$0xff]  ;;  %v509_v4 = vpack.c.bf16 %v99_v2, %v98_v1  ;;  %v83_v5 = vld [vmem:[#allocation5 + $0x8] sm:$0xff]  ;;  %v100_v6 = vld [vmem:[#allocation5 + $0x90] sm:$0xff]  ;;  %s738_s30 = smov [#allocation10]  }
  0x4c   :  { %v101_v7 = vld [vmem:[#allocation5 + $0x98] sm:$0xff]  ;;  %v511_v8 = vpack.c.bf16 %v83_v5, %v82_v3  ;;  %v84_v10 = vld [vmem:[#allocation5 + $0x10] sm:$0xff]  ;;  %v102_v12 = vld [vmem:[#allocation5 + $0xa0] sm:$0xff]  ;;  %s409_s8 = sshll.u32 %s738_s30, 4  ;;  %s410_s8 = int_to_ptr.vmem [resolvable:$true] %s409_s8 }
  0x4d   :  { %v513_v9 = vpack.c.bf16 %v101_v7, %v100_v6  ;;  %v85_v11 = vld [vmem:[#allocation5 + $0x18] sm:$0xff]  ;;  %510 = vmatprep.subr.bf16.mxu0 %v509_v4  ;;  %v103_v13 = vld [vmem:[#allocation5 + $0xa8] sm:$0xff]  ;;  %v86_v16 = vld [vmem:[#allocation5 + $0x20] sm:$0xff]  ;;  %p702_p5 = scmp.lt.s32.totalorder %s410_s8, %s410_s8 }
  0x4e   :  { %512 = vmatpush3.bf16.msra.mxu0 %v511_v8  ;;  %v515_v14 = vpack.c.bf16 %v85_v11, %v84_v10  ;;  %v517_v15 = vpack.c.bf16 %v103_v13, %v102_v12  ;;  %v87_v17 = vld [vmem:[#allocation5 + $0x28] sm:$0xff]  ;;  %v104_v18 = vld [vmem:[#allocation5 + $0xb0] sm:$0xff]  ;;  %v105_v19 = vld [vmem:[#allocation5 + $0xb8] sm:$0xff]  ;;  %v737_v12 = vmov 0.0  }
  0x4f   :  { %514 = vmatprep.subr.bf16.mxu0 %v513_v9  ;;  %v519_v20 = vpack.c.bf16 %v87_v17, %v86_v16  ;;  %v521_v21 = vpack.c.bf16 %v105_v19, %v104_v18  ;;  %v88_v22 = vld [vmem:[#allocation5 + $0x30] sm:$0xff]  ;;  %v89_v23 = vld [vmem:[#allocation5 + $0x38] sm:$0xff]  ;;  %v106_v24 = vld [vmem:[#allocation5 + $0xc0] sm:$0xff]  ;;  %506 = vmatprep.mubr.msk.f32.mxu1 %vm736_vm0, %v737_v12 }
  0x50   :  { %v107_v25 = vld [vmem:[#allocation5 + $0xc8] sm:$0xff]  ;;  %v81_v26 = vld [vmem:[#allocation2 + $0x8] sm:$0xff]  ;;  %v192_v27 = vld [vmem:[#allocation7] sm:$0xff]  ;;  %v523_v29 = vpack.c.bf16 %v89_v23, %v88_v22 }
  0x51   :  { %185 = vmatprep.mubr.f32.mxu0 %v81_v26  ;;  %v193_v28 = vld [vmem:[#allocation7 + $0x8] sm:$0xff]  ;;  %v194_v31 = vld [vmem:[#allocation7 + $0x10] sm:$0xff]  ;;  %v195_v32 = vld [vmem:[#allocation7 + $0x18] sm:$0xff]  ;;  %v525_v33 = vpack.c.bf16 %v107_v25, %v106_v24 }
  0x52   :  { %516 = vmatpush3.bf16.msra.mxu0 %v515_v14  ;;  %v542_v30 = vpack.c.bf16 %v193_v28, %v192_v27  ;;  %v90_v34 = vld [vmem:[#allocation5 + $0x40] sm:$0xff]  ;;  %v91_v35 = vld [vmem:[#allocation5 + $0x48] sm:$0xff]  ;;  %v108_v36 = vld [vmem:[#allocation5 + $0xd0] sm:$0xff]  ;;  %v545_v38 = vpack.c.bf16 %v195_v32, %v194_v31 }
  0x53   :  { %518 = vmatprep.subr.bf16.mxu0 %v517_v15  ;;  %v109_v37 = vld [vmem:[#allocation5 + $0xd8] sm:$0xff]  ;;  %v196_v39 = vld [vmem:[#allocation7 + $0x20] sm:$0xff]  ;;  %v197_v40 = vld [vmem:[#allocation7 + $0x28] sm:$0xff]  ;;  %v527_v41 = vpack.c.bf16 %v91_v35, %v90_v34 }
  0x54   :  { %543 = vmatpush3.bf16.msra.mxu1 %v542_v30  ;;  %v529_v42 = vpack.c.bf16 %v109_v37, %v108_v36  ;;  %v92_v43 = vld [vmem:[#allocation5 + $0x50] sm:$0xff]  ;;  %v93_v44 = vld [vmem:[#allocation5 + $0x58] sm:$0xff]  ;;  %v110_v45 = vld [vmem:[#allocation5 + $0xe0] sm:$0xff]  ;;  %v548_v47 = vpack.c.bf16 %v197_v40, %v196_v39 }
  0x55   :  { %544 = vmatprep.subr.bf16.mxu1 %v735_v0  ;;  %v111_v46 = vld [vmem:[#allocation5 + $0xe8] sm:$0xff]  ;;  %v198_v48 = vld [vmem:[#allocation7 + $0x30] sm:$0xff]  ;;  %v199_v49 = vld [vmem:[#allocation7 + $0x38] sm:$0xff]  ;;  %v531_v50 = vpack.c.bf16 %v93_v44, %v92_v43 }
  0x56   :  { %520 = vmatpush3.bf16.msra.mxu0 %v519_v20  ;;  %v533_v51 = vpack.c.bf16 %v111_v46, %v110_v45  ;;  %v94_v52 = vld [vmem:[#allocation5 + $0x60] sm:$0xff]  ;;  %v95_v53 = vld [vmem:[#allocation5 + $0x68] sm:$0xff]  ;;  %v112_v54 = vld [vmem:[#allocation5 + $0xf0] sm:$0xff]  ;;  %v551_v56 = vpack.c.bf16 %v199_v49, %v198_v48 }
  0x57   :  { %522 = vmatprep.subr.bf16.mxu0 %v521_v21  ;;  %v113_v55 = vld [vmem:[#allocation5 + $0xf8] sm:$0xff]  ;;  %v200_v57 = vld [vmem:[#allocation7 + $0x40] sm:$0xff]  ;;  %v201_v58 = vld [vmem:[#allocation7 + $0x48] sm:$0xff]  ;;  %v535_v59 = vpack.c.bf16 %v95_v53, %v94_v52 }
  0x58   :  { %546 = vmatpush3.bf16.msra.mxu1 %v545_v38  ;;  %v537_v60 = vpack.c.bf16 %v113_v55, %v112_v54  ;;  %v96_v61 = vld [vmem:[#allocation5 + $0x70] sm:$0xff]  ;;  %v97_v62 = vld [vmem:[#allocation5 + $0x78] sm:$0xff]  ;;  %v554_v63 = vpack.c.bf16 %v201_v58, %v200_v57  ;;  %v204_v6 = vld [vmem:[#allocation7 + $0x60] sm:$0xff] }
  0x59   :  { %547 = vmatprep.subr.bf16.mxu1 %v735_v0  ;;  %v202_v1 = vld [vmem:[#allocation7 + $0x50] sm:$0xff]  ;;  %v203_v2 = vld [vmem:[#allocation7 + $0x58] sm:$0xff]  ;;  %v539_v3 = vpack.c.bf16 %v97_v62, %v96_v61  ;;  %v205_v7 = vld [vmem:[#allocation7 + $0x68] sm:$0xff] }
  0x5a   :  { %524 = vmatpush3.bf16.msra.mxu0 %v523_v29  ;;  %v557_v4 = vpack.c.bf16 %v203_v2, %v202_v1  ;;  %v80_v5 = vld [vmem:[#allocation2] sm:$0xff]  ;;  %v560_v8 = vpack.c.bf16 %v205_v7, %v204_v6  ;;  %v207_v10 = vld [vmem:[#allocation7 + $0x78] sm:$0xff]  ;;  %v287_v13 = vld [vmem:[#allocation8 + $0x8] sm:$0xff] }
  0x5b   :  { %526 = vmatprep.subr.bf16.mxu0 %v525_v33  ;;  %v206_v9 = vld [vmem:[#allocation7 + $0x70] sm:$0xff]  ;;  %v289_v14 = vld [vmem:[#allocation8 + $0x18] sm:$0xff]  ;;  %v286_v15 = vld [vmem:[#allocation8] sm:$0xff] }
  0x5c   :  { %549 = vmatpush3.bf16.msra.mxu1 %v548_v47  ;;  %v563_v11 = vpack.c.bf16 %v207_v10, %v206_v9  ;;  %v565_v16 = vpack.c.bf16 %v289_v14, %v287_v13  ;;  %v288_v17 = vld [vmem:[#allocation8 + $0x10] sm:$0xff]  ;;  %v291_v18 = vld [vmem:[#allocation8 + $0x28] sm:$0xff]  ;;  %v293_v19 = vld [vmem:[#allocation8 + $0x38] sm:$0xff] }
  0x5d   :  { %550 = vmatprep.subr.bf16.mxu1 %v735_v0  ;;  %v567_v20 = vpack.c.bf16 %v288_v17, %v286_v15  ;;  %v569_v21 = vpack.c.bf16 %v293_v19, %v291_v18  ;;  %v290_v22 = vld [vmem:[#allocation8 + $0x20] sm:$0xff]  ;;  %v292_v23 = vld [vmem:[#allocation8 + $0x30] sm:$0xff]  ;;  %v297_v24 = vld [vmem:[#allocation8 + $0x58] sm:$0xff] }
  0x5e   :  { %528 = vmatpush3.bf16.msra.mxu0 %v527_v41  ;;  %v571_v25 = vpack.c.bf16 %v292_v23, %v290_v22  ;;  %v294_v27 = vld [vmem:[#allocation8 + $0x40] sm:$0xff]  ;;  %v296_v28 = vld [vmem:[#allocation8 + $0x50] sm:$0xff]  ;;  %v299_v29 = vld [vmem:[#allocation8 + $0x68] sm:$0xff] }
  0x5f   :  { %530 = vmatprep.subr.bf16.mxu0 %v529_v42  ;;  %v301_v30 = vld [vmem:[#allocation8 + $0x78] sm:$0xff]  ;;  %v575_v31 = vpack.c.bf16 %v296_v28, %v294_v27  ;;  %v298_v33 = vld [vmem:[#allocation8 + $0x60] sm:$0xff]  ;;  %v300_v34 = vld [vmem:[#allocation8 + $0x70] sm:$0xff] }
  0x60   :  { %552 = vmatpush3.bf16.msra.mxu1 %v551_v56  ;;  %v577_v32 = vpack.c.bf16 %v301_v30, %v299_v29  ;;  %v303_v35 = vld [vmem:[#allocation8 + $0x88] sm:$0xff]  ;;  %v305_v36 = vld [vmem:[#allocation8 + $0x98] sm:$0xff]  ;;  %v579_v37 = vpack.c.bf16 %v300_v34, %v298_v33  ;;  %v302_v39 = vld [vmem:[#allocation8 + $0x80] sm:$0xff] }
  0x61   :  { %553 = vmatprep.subr.bf16.mxu1 %v735_v0  ;;  %v581_v38 = vpack.c.bf16 %v305_v36, %v303_v35  ;;  %v304_v40 = vld [vmem:[#allocation8 + $0x90] sm:$0xff]  ;;  %v307_v41 = vld [vmem:[#allocation8 + $0xa8] sm:$0xff]  ;;  %v309_v42 = vld [vmem:[#allocation8 + $0xb8] sm:$0xff] }
  0x62   :  { %532 = vmatpush3.bf16.msra.mxu0 %v531_v50  ;;  %v583_v43 = vpack.c.bf16 %v304_v40, %v302_v39  ;;  %v585_v44 = vpack.c.bf16 %v309_v42, %v307_v41  ;;  %v306_v45 = vld [vmem:[#allocation8 + $0xa0] sm:$0xff]  ;;  %v308_v46 = vld [vmem:[#allocation8 + $0xb0] sm:$0xff]  ;;  %v311_v47 = vld [vmem:[#allocation8 + $0xc8] sm:$0xff] }
  0x63   :  { %534 = vmatprep.subr.bf16.mxu0 %v533_v51  ;;  %v313_v48 = vld [vmem:[#allocation8 + $0xd8] sm:$0xff]  ;;  %v587_v49 = vpack.c.bf16 %v308_v46, %v306_v45  ;;  %v310_v51 = vld [vmem:[#allocation8 + $0xc0] sm:$0xff]  ;;  %v312_v52 = vld [vmem:[#allocation8 + $0xd0] sm:$0xff] }
  0x64   :  { %555 = vmatpush3.bf16.msra.mxu1 %v554_v63  ;;  %v589_v50 = vpack.c.bf16 %v313_v48, %v311_v47  ;;  %v591_v53 = vpack.c.bf16 %v312_v52, %v310_v51  ;;  %v420_v55 = vld [vmem:[%s864_s2] ss:$0 sm:$0xff]  ;;  %v317_v61 = vld [vmem:[#allocation8 + $0xf8] sm:$0xff]  ;;  %v314_v63 = vld [vmem:[#allocation8 + $0xe0] sm:$0xff] }
  0x65   :  { %556 = vmatprep.subr.bf16.mxu1 %v735_v0  ;;  %v316_v1 = vld [vmem:[#allocation8 + $0xf0] sm:$0xff] }
  0x66   :  { %536 = vmatpush3.bf16.msra.mxu0 %v535_v59  ;;  %v595_v2 = vpack.c.bf16 %v316_v1, %v314_v63 }
  0x67   :  { %538 = vmatprep.subr.bf16.mxu0 %v537_v60  ;;  %v315_v60 = vld [vmem:[#allocation8 + $0xe8] sm:$0xff] }
  0x68   :  { %558 = vmatpush3.bf16.msra.mxu1 %v557_v4  ;;  %v593_v62 = vpack.c.bf16 %v317_v61, %v315_v60 }
  0x69   :  { %559 = vmatprep.subr.bf16.mxu1 %v735_v0 }
  0x6a   :  { %540 = vmatpush3.bf16.msra.mxu0 %v539_v3  ;;  %v421_v3 = vld [vmem:[%s866_s4] ss:$0 sm:$0xff]  ;;  %s697_s4 = scalar_lea.vmem %s410_s8, 256 }
  0x6b   :  { %566 = vmatprep.subr.bf16.mxu0 %v565_v16  ;;  %p698_p4 = scmp.ne.s32.totalorder %s410_s8, %s697_s4  ;;  %p703_p6 = scmp.lt.s32.totalorder %s697_s4, %s697_s4 }
  0x6c   :  { %561 = vmatpush3.bf16.msra.mxu1 %v560_v8  ;;  %v320_v8 = vlaneseq }
  0x6d   :  { %186 = vmatmul.mubr.f32.vlgmr.msra.gmra.mrb[0].mxu0 %v80_v5  ;;  %562 = vmatprep.subr.bf16.mxu1 %v735_v0  ;;  %v295_v0 = vld [vmem:[#allocation8 + $0x48] sm:$0xff]  ;;  %p704_p7 = por %p703_p6, %p702_p5 }
  0x6e   :  { %394 = vmatprep.mubr.f32.mxu0 %v737_v12  ;;  %568 = vmatpush1.bf16.msra.mxu0 %v567_v20  ;;  %v573_v26 = vpack.c.bf16 %v297_v24, %v295_v0  ;;  %v321_v9 = vshrl.u32 %v320_v8, 7 }
  0x6f   :  { %570 = vmatprep.subr.bf16.mxu0 %v569_v21  ;;  %p705_p8 = pnand %p704_p7, %p698_p4 }
  0x70   :  { %564 = vmatpush3.bf16.msra.mxu1 %v563_v11  ;;  %v322_v10 = vsub.s32 0, %v321_v9  ;;  %v318_v11 = vld [vmem:[%s868_s6] sm:$0x3]  ;;  %v326_v12 = vsub.s32 1, %v321_v9 }
  0x72   :  { %572 = vmatpush1.bf16.msra.mxu0 %v571_v25  ;;  %v323_v13 = vrot.slane %v318_v11, %v322_v10  ;;  %v327_v14 = vrot.slane %v318_v11, %v326_v12 }
  0x73   :  { %574 = vmatprep.subr.bf16.mxu0 %v573_v26 }
  0x76   :  { %576 = vmatpush1.bf16.msra.mxu0 %v575_v31 }
  0x77   :  { %578 = vmatprep.subr.bf16.mxu0 %v577_v32 }
  0x7a   :  { %580 = vmatpush1.bf16.msra.mxu0 %v579_v37 }
  0x7b   :  { %582 = vmatprep.subr.bf16.mxu0 %v581_v38 }
  0x7e   :  { %584 = vmatpush1.bf16.msra.mxu0 %v583_v43 }
  0x7f   :  { %586 = vmatprep.subr.bf16.mxu0 %v585_v44 }
  0x82   :  { %588 = vmatpush1.bf16.msra.mxu0 %v587_v49 }
  0x83   :  { %590 = vmatprep.subr.bf16.mxu0 %v589_v50 }
  0x86   :  { %592 = vmatpush1.bf16.msra.mxu0 %v591_v53 }
  0x87   :  { %594 = vmatprep.subr.bf16.mxu0 %v593_v62 }
  0x8a   :  { %596 = vmatpush1.bf16.msra.mxu0 %v595_v2 }
 0x140   :  { %v454_v54 = vpop.f32.mrb[0].mxu0 }
 0x141   :  { %v455_v56 = vpop.f32.mrb[1].mxu0 }
 0x142   :  { %v456_v57 = vadd.f32 %v455_v56, %v454_v54 }
 0x144   :  { %v188_v58 = vadd.f32 %v456_v57, %v420_v55 }
 0x146   :  { %v191_v59 = vmax.f32 %v188_v58, 0.0 }
 0x148   :  { %507 = vmatmul.mubr.f32.vlgmr.msra.gmra.mrb[0].mxu1 %v191_v59 }
 0x21b   :  { %v281_v4 = vpop.f32.mrb[0].mxu1 }
 0x21c   :  { %v282_v5 = vadd.f32 %v421_v3, %v281_v4  ;;  %v508_v6 = vpop.f32.mrb[1].mxu1 }
 0x21e   :  { %v285_v7 = vmax.f32 %v282_v5, 0.0 }
 0x220   :  { %395 = vmatmul.mubr.f32.vlgmr.msra.gmra.mrb[2].mxu0 %v285_v7 }
 0x2f3   :  { %v396_v15 = vpop.f32.mrb[2].mxu0 }
 0x2f4   :  { %v397_v16 = vadd.f32 %v396_v15, %v323_v13  ;;  %v398_v17 = vpop.f32.mrb[3].mxu0 }
 0x2f5   :  { %v399_v18 = vadd.f32 %v398_v17, %v327_v14 }
 0x2f6   :  { %401 = vst [vmem:[#allocation10] sm:$0xff] %v397_v16 }
 0x2f7   :  { %402 = vst [vmem:[#allocation10 + $0x8] sm:$0xff] %v399_v18 }
 0x2f8   :  { %708 = shalt.err (!%p705_p8)
}
 0x2f9   :  { %s709_s10 = scalar_lea.hbm %s869_s7, 256 }
 0x2fa   :  { %p710_p9 = scmp.ne.s32.totalorder %s869_s7, %s709_s10  ;;  %p713_p10 = scmp.lt.u32.totalorder %s709_s10, %s869_s7 }
 0x2fc   :  { %p715_p11 = pnand %p713_p10, %p710_p9 }
 0x2fe   :  { %718 = shalt.err (!%p715_p11)
}
 0x2ff   :  { %412 = dma.vmem_to_hbm [thread:$0]  %s410_s8, 256, %s869_s7, [#allocation4]  }
 0x300   :  { %725 = dma.done.wait [#allocation4], 256  }
 0x301   :  { %726 = vsyncadd [#allocation4], 4294967040 }
 0x302   :  { %416 = vsyncpa [#allocation3], 1 }
 0x303   :  { %417 = vsyncpa [#allocation6], 1 }
 0x304   :  { %418 = vsyncpa [#allocation9], 1 }
 0x305   :  { %419 = vsyncpa [#allocation4], 1 }

</bundles_post_ra>
